<compile_context>
chip_gen: v7x
topology: tpu7x:2x2x1
jax: 0.10.0
libtpu: 0.0.40
codegen_flags: <defaults>
</compile_context>

<pallas_src>
import functools

import jax
import jax.numpy as jnp
from jax.experimental import pallas as pl
from jax.experimental.pallas import tpu as pltpu


def _round_up(n, m):
    return ((n + m - 1) // m) * m


def _chip_info():
    """(vmem_capacity_bytes, num_tensorcores) with safe fallbacks.

    v5e/v6e: 128 MiB VMEM, 1 TC/chip.  v7x: 64 MiB VMEM, 2 TC/chip.  If the
    query fails we default to the conservative (v7x-sized) VMEM and a single
    TensorCore (so we never force a batch split we cannot justify)."""
    vmem_cap = 64 << 20
    num_tc = 1
    try:
        info = pltpu.get_tpu_info()
        vmem_cap = int(getattr(info, "vmem_capacity_bytes", vmem_cap))
    except Exception:
        pass
    try:
        num_tc = int(getattr(jax.devices()[0], "num_cores", num_tc))
    except Exception:
        pass
    vmem_cap = min(max(vmem_cap, 16 << 20), 128 << 20)
    return vmem_cap, max(1, num_tc)


def _pick_tiles(B, OCp, Lx, Lslab, KK, CHUNK, block_budget, num_tc):
    """Pick (TB, TOC); return (TB, TOC, estimated_vmem_bytes).

    TB must be B or a multiple of 8 (the 2-D x block (TB, Lx) has TB as its
    second-to-last dim); TOC is a multiple of 8 (OCp is padded by caller)."""

    def need(tb, toc):
        blocks = 4 * (tb * Lx + toc * KK + toc + tb * toc * Lslab)
        scratch = 4 * (tb * KK * CHUNK + tb * toc * (KK + CHUNK))
        return 2 * blocks + scratch          # BlockSpec double-buffers blocks

    tb_cands = [d for d in range(1, B + 1)
                if B % d == 0 and (d == B or d % 8 == 0)]
    toc_cands = [d for d in range(8, OCp + 1, 8) if OCp % d == 0] or [OCp]

    TB = max(tb_cands)                       # = B: fewest grid steps
    fitting = [d for d in toc_cands if need(TB, d) <= block_budget]
    TOC = max(fitting) if fitting else min(toc_cands)
    while need(TB, TOC) > block_budget and TB > min(tb_cands):
        TB = max(d for d in tb_cands if d < TB)
    # TODO(synk): add an output-row grid axis if a single (TB, TOC, Lslab)
    # block still exceeds the budget (huge images); not reachable for this
    # module's tiny-image use case.

    # Megacore: v5e/v6e have a single TensorCore, so never split batch just
    # to create grid extent (it only multiplies the ~0.35us per-step cost).
    # On multi-TC chips the *parallel* OC axis already feeds the second core
    # when OCp//TOC >= 2; only split batch when that axis collapses to 1.
    if num_tc >= 2 and OCp // TOC == 1 and B // TB == 1:
        smaller = [d for d in tb_cands if d <= B // 2]
        if smaller:
            TB = max(smaller)
    return TB, TOC, need(TB, TOC)


def _conv2d_kernel(*refs, K, W, CHUNK, has_bias):
    """Valid conv as a per-chunk MXU matmul over the K*K shifted windows.

    refs: (w_ref (TOC, K*K) VMEM, [b_ref (TOC, 1) VMEM],
           x_ref (TB, Lx) VMEM, o_ref (TB, TOC, Lslab) VMEM)
    """
    if has_bias:
        w_ref, b_ref, x_ref, o_ref = refs
    else:
        w_ref, x_ref, o_ref = refs
        b_ref = None

    TB, TOC, Lslab = o_ref.shape
    KK = K * K

    # Hoisted out of the chunk loop (JAX does not CSE broadcast_in_dim).
    w_b = jnp.broadcast_to(w_ref[...][None, :, :], (TB, TOC, KK))
    bias = b_ref[...][None, :, :] if has_bias else None       # (1, TOC, 1)

    # Lane-chunk loop: only one chunk's K*K windows are live at a time, so
    # vreg/VMEM pressure is bounded for non-toy image sizes.  CHUNK divides
    # Lslab by construction (wrapper).
    for c0 in range(0, Lslab, CHUNK):
        # K*K shifted windows of this chunk, shared by every output channel.
        # The tap index sits on the sublane (2nd-minor) axis so the MXU
        # contracts over it; the accumulate never touches the VALU.
        wins = jnp.stack(
            [x_ref[:, c0 + ki * W + kj: c0 + ki * W + kj + CHUNK]
             for ki in range(K) for kj in range(K)],
            axis=1)                                            # (TB, KK, CHUNK)
        acc = jnp.einsum("bok,bkl->bol", w_b, wins,
                         preferred_element_type=jnp.float32,
                         precision=jax.lax.Precision.HIGHEST)  # (TB, TOC, CHUNK)
        if has_bias:
            acc = acc + bias
        o_ref[:, :, c0:c0 + CHUNK] = acc.astype(o_ref.dtype)


def conv2d_forward(x, weight, bias=None):
    """Valid 2-D convolution, in_channels == 1, stride 1, no padding."""
    B, Cin, H, W = x.shape
    assert Cin == 1
    OC, _, K, K2 = weight.shape
    assert K == K2
    OH, OW = H - K + 1, W - K + 1
    assert OH > 0 and OW > 0
    KK = K * K

    # Flattened spatial axis: output position p = oh*W + ow, tap (ki,kj) is a
    # static lane shift of ki*W + kj.  CHUNK | Lslab, both multiples of 128.
    CHUNK = min(2048, _round_up(OH * W, 128))
    Lslab = _round_up(OH * W, CHUNK)
    max_off = (K - 1) * W + (K - 1)
    Lx = _round_up(Lslab + max_off, 128)      # lane-aligned input slab

    xf = x.reshape(B, H * W).astype(jnp.float32)
    xf = jnp.pad(xf, ((0, 0), (0, Lx - H * W)))

    # Channels padded to a multiple of 8: full-sublane weight/output tiles
    # (unmasked stores) and a TOC that always satisfies the (8,128) rule.
    OCp = _round_up(OC, 8)
    wf = jnp.pad(weight.reshape(OC, KK).astype(jnp.float32),
                 ((0, OCp - OC), (0, 0)))
    has_bias = bias is not None
    if has_bias:
        bf = jnp.pad(bias.reshape(OC, 1).astype(jnp.float32),
                     ((0, OCp - OC), (0, 0)))

    vmem_cap, num_tc = _chip_info()
    block_budget = max(8 << 20, (vmem_cap * 3) // 8)   # ~24 MiB v7x, ~48 MiB v5e/v6e
    TB, TOC, vmem_need = _pick_tiles(B, OCp, Lx, Lslab, KK, CHUNK,
                                     block_budget, num_tc)
    grid = (B // TB, OCp // TOC)
    vmem_limit = int(min(max(vmem_need + (2 << 20), 4 << 20),
                         (vmem_cap * 3) // 4))

    # NOTE: keep the OC grid axis innermost -- the x index_map ignores `o`, so
    # consecutive o-steps reuse the resident x block with no extra input DMA.
    in_specs = [pl.BlockSpec((TOC, KK), lambda b, o: (o, 0))]   # weights (VMEM)
    args = [wf]
    if has_bias:
        in_specs.append(pl.BlockSpec((TOC, 1), lambda b, o: (o, 0)))
        args.append(bf)
    in_specs.append(pl.BlockSpec((TB, Lx), lambda b, o: (b, 0)))
    args.append(xf)

    out_flat = pl.pallas_call(
        functools.partial(_conv2d_kernel, K=K, W=W, CHUNK=CHUNK,
                          has_bias=has_bias),
        out_shape=jax.ShapeDtypeStruct((B, OCp, Lslab), jnp.float32),
        grid_spec=pltpu.PrefetchScalarGridSpec(
            num_scalar_prefetch=0,
            grid=grid,
            in_specs=in_specs,
            out_specs=pl.BlockSpec((TB, TOC, Lslab), lambda b, o: (b, o, 0)),
        ),
        compiler_params=pltpu.CompilerParams(
            dimension_semantics=("parallel", "parallel"),
            vmem_limit_bytes=vmem_limit),
    )(*args)

    # Back to NCHW: drop pad channels, column-wrap and pad-tail garbage.
    # Cheap XLA slice/reshape on a contiguous buffer, outside the kernel.
    # TODO(synk): fuse the consumer onto out_flat (or emit NCHW directly with
    # an output-row grid axis) if this post-pass ever matters at large sizes.
    out = out_flat[:, :OC, :OH * W].reshape(B, OC, OH, W)[:, :, :, :OW]
    return out.astype(x.dtype)


class Conv2dPallas:
    """Mirror of syft Conv2d.__init__ constraints; deterministic init."""

    def __init__(self, in_channels, out_channels, kernel_size, stride=1,
                 padding=0, dilation=1, groups=1, bias=False,
                 padding_mode="zeros", *, key):
        assert in_channels == 1
        assert stride == 1 and padding == 0 and dilation == 1 and groups == 1
        assert padding_mode == "zeros"
        self.in_channels = in_channels
        self.out_channels = out_channels
        self.kernel_size = kernel_size
        self.has_bias = bias

        kw, kb = jax.random.split(key)
        fan_in = in_channels * kernel_size * kernel_size
        bound = 1.0 / (fan_in ** 0.5)   # torch.nn.Conv2d default init range
        self.weight = jax.random.uniform(
            kw, (out_channels, in_channels, kernel_size, kernel_size),
            jnp.float32, minval=-bound, maxval=bound)
        if bias:
            self.bias = jax.random.uniform(
                kb, (out_channels,), jnp.float32, minval=-bound, maxval=bound)
        else:
            self.bias = None

    def __call__(self, x):
        return conv2d_forward(x, self.weight, self.bias)


def _reference(x, w, b):
    out = jax.lax.conv_general_dilated(
        x, w, window_strides=(1, 1), padding="VALID",
        dimension_numbers=("NCHW", "OIHW", "NCHW"),
        precision=jax.lax.Precision.HIGHEST)
    if b is not None:
        out = out + b[None, :, None, None]
    return out


if __name__ == "__main__":
    key = jax.random.PRNGKey(0)
    k_x, k_m1, k_m2, k_m3 = jax.random.split(key, 4)

    B, C, H, W = 2, 1, 16, 16       # in_channels must be 1 (module assert)
    OC, K = 4, 3

    x = jax.random.normal(k_x, (B, C, H, W), jnp.float32)

    layer_nobias = Conv2dPallas(C, OC, K, bias=False, key=k_m1)
    layer_bias = Conv2dPallas(C, OC, K, bias=True, key=k_m2)
    layer_wide = Conv2dPallas(C, 32, 5, bias=True, key=k_m3)   # wider-OC path

    out_nb = jax.block_until_ready(layer_nobias(x))
    out_b = jax.block_until_ready(layer_bias(x))
    out_w = jax.block_until_ready(layer_wide(x))

    ref_nb = _reference(x, layer_nobias.weight, layer_nobias.bias)
    ref_b = _reference(x, layer_bias.weight, layer_bias.bias)
    ref_w = _reference(x, layer_wide.weight, layer_wide.bias)

    assert out_nb.shape == (B, OC, H - K + 1, W - K + 1)
    assert out_b.shape == (B, OC, H - K + 1, W - K + 1)
    assert out_w.shape == (B, 32, H - 5 + 1, W - 5 + 1)
    assert jnp.allclose(out_nb, ref_nb, atol=1e-4, rtol=1e-4)
    assert jnp.allclose(out_b, ref_b, atol=1e-4, rtol=1e-4)
    assert jnp.allclose(out_w, ref_w, atol=1e-4, rtol=1e-4)

    print("KERNEL_OK")
</pallas_src>

<mosaic_0001>
module attributes {stable_mosaic.version = 11 : i64} {
  func.func @_conv2d_kernel(%arg0: i32, %arg1: i32, %arg2: memref<8x9xf32, #tpu.memory_space<vmem>>, %arg3: memref<2x384xf32, #tpu.memory_space<vmem>>, %arg4: memref<2x8x256xf32, #tpu.memory_space<vmem>>) attributes {dimension_semantics = [#tpu.dimension_semantics<parallel>, #tpu.dimension_semantics<parallel>], iteration_bounds = array<i64: 1, 1>, scalar_prefetch = 0 : i64, scratch_operands = 0 : i64, tpu.core_type = #tpu.core_type<tc>, window_params = [{transform_indices = @transform_0, window_bounds = array<i64: 8, 9>}, {transform_indices = @transform_1, window_bounds = array<i64: 2, 384>}, {transform_indices = @transform_2, window_bounds = array<i64: 2, 8, 256>}]} {
    %c0 = arith.constant 0 : index
    %c0_0 = arith.constant 0 : index
    %0 = vector.load %arg2[%c0, %c0_0] : memref<8x9xf32, #tpu.memory_space<vmem>>, vector<8x9xf32>
    %1 = vector.shape_cast %0 : vector<8x9xf32> to vector<1x8x9xf32>
    %2 = vector.shape_cast %1 : vector<1x8x9xf32> to vector<1x8x9xf32>
    %3 = vector.broadcast %2 : vector<1x8x9xf32> to vector<2x8x9xf32>
    %c0_1 = arith.constant 0 : index
    %c0_2 = arith.constant 0 : index
    %4 = vector.load %arg3[%c0_1, %c0_2] : memref<2x384xf32, #tpu.memory_space<vmem>>, vector<2x256xf32>
    %c0_3 = arith.constant 0 : index
    %c1 = arith.constant 1 : index
    %5 = vector.load %arg3[%c0_3, %c1] : memref<2x384xf32, #tpu.memory_space<vmem>>, vector<2x256xf32>
    %c0_4 = arith.constant 0 : index
    %c2 = arith.constant 2 : index
    %6 = vector.load %arg3[%c0_4, %c2] : memref<2x384xf32, #tpu.memory_space<vmem>>, vector<2x256xf32>
    %c0_5 = arith.constant 0 : index
    %c16 = arith.constant 16 : index
    %7 = vector.load %arg3[%c0_5, %c16] : memref<2x384xf32, #tpu.memory_space<vmem>>, vector<2x256xf32>
    %c0_6 = arith.constant 0 : index
    %c17 = arith.constant 17 : index
    %8 = vector.load %arg3[%c0_6, %c17] : memref<2x384xf32, #tpu.memory_space<vmem>>, vector<2x256xf32>
    %c0_7 = arith.constant 0 : index
    %c18 = arith.constant 18 : index
    %9 = vector.load %arg3[%c0_7, %c18] : memref<2x384xf32, #tpu.memory_space<vmem>>, vector<2x256xf32>
    %c0_8 = arith.constant 0 : index
    %c32 = arith.constant 32 : index
    %10 = vector.load %arg3[%c0_8, %c32] : memref<2x384xf32, #tpu.memory_space<vmem>>, vector<2x256xf32>
    %c0_9 = arith.constant 0 : index
    %c33 = arith.constant 33 : index
    %11 = vector.load %arg3[%c0_9, %c33] : memref<2x384xf32, #tpu.memory_space<vmem>>, vector<2x256xf32>
    %c0_10 = arith.constant 0 : index
    %c34 = arith.constant 34 : index
    %12 = vector.load %arg3[%c0_10, %c34] : memref<2x384xf32, #tpu.memory_space<vmem>>, vector<2x256xf32>
    %13 = vector.shape_cast %4 : vector<2x256xf32> to vector<2x1x256xf32>
    %14 = vector.shape_cast %5 : vector<2x256xf32> to vector<2x1x256xf32>
    %15 = vector.shape_cast %6 : vector<2x256xf32> to vector<2x1x256xf32>
    %16 = vector.shape_cast %7 : vector<2x256xf32> to vector<2x1x256xf32>
    %17 = vector.shape_cast %8 : vector<2x256xf32> to vector<2x1x256xf32>
    %18 = vector.shape_cast %9 : vector<2x256xf32> to vector<2x1x256xf32>
    %19 = vector.shape_cast %10 : vector<2x256xf32> to vector<2x1x256xf32>
    %20 = vector.shape_cast %11 : vector<2x256xf32> to vector<2x1x256xf32>
    %21 = vector.shape_cast %12 : vector<2x256xf32> to vector<2x1x256xf32>
    %22 = tpu.concatenate %13, %14, %15, %16, %17, %18, %19, %20, %21 in 1 : vector<2x1x256xf32>, vector<2x1x256xf32>, vector<2x1x256xf32>, vector<2x1x256xf32>, vector<2x1x256xf32>, vector<2x1x256xf32>, vector<2x1x256xf32>, vector<2x1x256xf32>, vector<2x1x256xf32> -> vector<2x9x256xf32>
    "tpu.trace_start"() <{level = 10 : i32, message = "bok,bkl->bol"}> : () -> ()
    %cst = arith.constant dense<0.000000e+00> : vector<2x8x256xf32>
    %23 = tpu.matmul %3, %22, %cst {dimension_numbers = #tpu.dot_dimension_numbers<[2], [1], [1], [2], [0, 0, 0, 1, 1, 2], [0], [0]>, precision = #tpu.contract_precision<fp32>} : vector<2x8x9xf32>, vector<2x9x256xf32>, vector<2x8x256xf32> -> vector<2x8x256xf32>
    "tpu.trace_stop"() : () -> ()
    %c0_11 = arith.constant 0 : index
    %c0_12 = arith.constant 0 : index
    %c0_13 = arith.constant 0 : index
    %24 = vector.load %arg4[%c0_11, %c0_12, %c0_13] : memref<2x8x256xf32, #tpu.memory_space<vmem>>, vector<2x8x256xf32>
    tpu.vector_store %arg4[%c0_11, %c0_12, %c0_13], %23 {strides = array<i32>} : memref<2x8x256xf32, #tpu.memory_space<vmem>>, vector<2x8x256xf32>,
    return
  }
  func.func @transform_0(%arg0: i32, %arg1: i32) -> (i32, i32) {
    %c0_i32 = arith.constant 0 : i32
    %c0_i32_0 = arith.constant 0 : i32
    return %arg1, %c0_i32 : i32, i32
  }
  func.func @transform_1(%arg0: i32, %arg1: i32) -> (i32, i32) {
    %c0_i32 = arith.constant 0 : i32
    %c0_i32_0 = arith.constant 0 : i32
    return %arg0, %c0_i32 : i32, i32
  }
  func.func @transform_2(%arg0: i32, %arg1: i32) -> (i32, i32, i32) {
    %c0_i32 = arith.constant 0 : i32
    %c0_i32_0 = arith.constant 0 : i32
    return %arg0, %arg1, %c0_i32 : i32, i32, i32
  }
}

</mosaic_0001>

<bundles_post_ra>
// kernel: tpu_custom_call.1
= control target key start
LH: loop header
LB: loop body
LE: loop exit
PB: predicated region body
PF: predicated region fallthrough
CT: control target
= control target key end

     0   :  { %7 = vsyncpa [#allocation3], 0  ;;  %s1744_s0 = inlined_call_operand.hbm [shape: f32[8,9], index: 0, kind: input, shape index: {}]   ;;  %s1745_s1 = inlined_call_operand.hbm [shape: f32[2,384], index: 1, kind: input, shape index: {}]   ;;  %s1746_s2 = inlined_call_operand.hbm [shape: f32[2,8,256], index: 2, kind: output, shape index: {}]  }
   0x1   :  { %8 = vsyncpa [#allocation6], 0 }
   0x2   :  { %9 = vsyncpa [#allocation4], 0  ;;  %s1472_s9 = smov [#allocation2]   ;;  %s1473_s11 = smov [#allocation5]  }
   0x3   :  { %s16_s10 = sshll.u32 %s1472_s9, 4  ;;  %s26_s12 = sshll.u32 %s1473_s11, 4  ;;  %s17_s10 = int_to_ptr.vmem [resolvable:$true] %s16_s10  ;;  %s27_s12 = int_to_ptr.vmem [resolvable:$true] %s26_s12 }
   0x4   :  { %s1400_s15 = scalar_lea.hbm %s1744_s0, 128 }
   0x5   :  { %p1401_p0 = scmp.ne.s32.totalorder %s1744_s0, %s1400_s15  ;;  %p1404_p1 = scmp.lt.u32.totalorder %s1400_s15, %s1744_s0 }
   0x7   :  { %p1406_p2 = pnand %p1404_p1, %p1401_p0 }
   0x9   :  { %1409 = shalt.err (!%p1406_p2)
}
   0xa   :  { %s1410_s20 = scalar_lea.vmem %s17_s10, 128  ;;  %p1415_p4 = scmp.lt.s32.totalorder %s17_s10, %s17_s10 }
   0xb   :  { %p1411_p3 = scmp.ne.s32.totalorder %s17_s10, %s1410_s20  ;;  %p1416_p5 = scmp.lt.s32.totalorder %s1410_s20, %s1410_s20 }
   0xd   :  { %p1417_p6 = por %p1416_p5, %p1415_p4 }
   0xf   :  { %p1418_p7 = pnand %p1417_p6, %p1411_p3 }
  0x11   :  { %1421 = shalt.err (!%p1418_p7)
}
  0x12   :  { %19 = dma.hbm_to_vmem [thread:$0]  %s1744_s0, 128, %s17_s10, [#allocation3]  }
  0x13   :  { %s1422_s25 = scalar_lea.hbm %s1745_s1, 96 }
  0x14   :  { %p1423_p8 = scmp.ne.s32.totalorder %s1745_s1, %s1422_s25  ;;  %p1426_p9 = scmp.lt.u32.totalorder %s1422_s25, %s1745_s1 }
  0x16   :  { %p1428_p10 = pnand %p1426_p9, %p1423_p8 }
  0x18   :  { %1431 = shalt.err (!%p1428_p10)
}
  0x19   :  { %s1432_s30 = scalar_lea.vmem %s27_s12, 96  ;;  %p1437_p12 = scmp.lt.s32.totalorder %s27_s12, %s27_s12 }
  0x1a   :  { %p1433_p11 = scmp.ne.s32.totalorder %s27_s12, %s1432_s30  ;;  %p1438_p13 = scmp.lt.s32.totalorder %s1432_s30, %s1432_s30 }
  0x1c   :  { %p1439_p0 = por %p1438_p13, %p1437_p12 }
  0x1e   :  { %p1440_p1 = pnand %p1439_p0, %p1433_p11 }
  0x20   :  { %1443 = shalt.err (!%p1440_p1)
}
  0x21   :  { %29 = dma.hbm_to_vmem [thread:$0]  %s1745_s1, 96, %s27_s12, [#allocation6]  }
  0x22   :  { %1466 = dma.done.wait [#allocation3], 128  }
  0x23   :  { %1467 = vsyncadd [#allocation3], 4294967168 }
  0x24   :  { %1468 = dma.done.wait [#allocation6], 96  }
  0x25   :  { %1469 = vsyncadd [#allocation6], 4294967200  ;;  %v57_v0 = vlaneseq  ;;  %v1317_v4 = vld.sshfl [vmem:[#allocation5] sm:$0x77 pattern:$0x75316420] }
  0x26   :  { %v56_v7 = vcombine.high %v1317_v4, %v1317_v4  ;;  %s1474_s4 = smov 126   ;;  %s1475_s5 = smov 127   ;;  %v1482_v13 = vmov 0.0   ;;  %vm113_vm0 = vcmask 1039360   ;;  %vm265_vm1 = vcmask 1040384  }
  0x27   :  { %v58_v1 = vshrl.u32 %v57_v0, 7  ;;  %s1476_s1 = smov 112   ;;  %s1477_s6 = smov 111   ;;  %376 = vmatprep.mubr.f32.mxu0 %v1482_v13  ;;  %871 = vmatprep.mubr.f32.mxu1 %v1482_v13  ;;  %vm134_vm2 = vcmask 1031168   ;;  %vm270_vm3 = vcmask 1041408   ;;  %vm155_vm4 = vcmask 916480  }
  0x28   :  { %s1478_s7 = smov 110   ;;  %s1479_s8 = smov 96   ;;  %v1316_v14 = vld.sshfl [vmem:[#allocation5] sm:$0x33 pattern:$0x75316420] }
  0x29   :  { %v87_v2 = vsub.s32 2, %v58_v1  ;;  %v1525_v3 = vsub.s32 1, %v58_v1  ;;  %v1529_v9 = vsub.s32 0, %v58_v1  ;;  %s1480_s9 = smov 95   ;;  %s1481_s10 = smov 94   ;;  %v47_v18 = vcombine.high %v1316_v14, %v1316_v14 }
  0x2a   :  { %vm275_vm5 = vcmask 1042432   ;;  %vm176_vm6 = vcmask 908288   ;;  %vm280_vm7 = vcmask 1043456   ;;  %vm197_vm8 = vcmask 900096   ;;  %s1483_s11 = smov [#allocation7]  }
  0x2b   :  { %v88_v5 = vrot.slane %v1317_v4, %v87_v2  ;;  %v84_v6 = vrot.slane %v1317_v4, %v1525_v3  ;;  %v96_v8 = vrot.slane %v56_v7, %v1525_v3  ;;  %v80_v10 = vrot.slane %v1317_v4, %v1529_v9  ;;  %s1303_s12 = sshll.u32 %s1483_s11, 4  ;;  %s1304_s12 = int_to_ptr.vmem [resolvable:$true] %s1303_s12 }
  0x2c   :  { %v100_v11 = vrot.slane %v56_v7, %v87_v2  ;;  %v92_v12 = vrot.slane %v56_v7, %v1529_v9  ;;  %v64_v17 = vrot.slane %v1316_v14, %v1525_v3  ;;  %v60_v23 = vrot.slane %v1316_v14, %v1529_v9  ;;  %s1444_s13 = scalar_lea.vmem %s1304_s12, 512  ;;  %p1449_p3 = scmp.lt.s32.totalorder %s1304_s12, %s1304_s12 }
  0x2d   :  { %126 = vrot.lane.b32.xlu1 %v88_v5, %s1474_s4  ;;  %103 = vrot.lane.b32.xlu0 %v84_v6, %s1475_s5  ;;  %v72_v24 = vrot.slane %v47_v18, %v1525_v3  ;;  %v68_v31 = vrot.slane %v47_v18, %v1529_v9  ;;  %vm285_vm9 = vcmask 1044480   ;;  %vm218_vm10 = vcmask 785408   ;;  %p1445_p2 = scmp.ne.s32.totalorder %s1304_s12, %s1444_s13  ;;  %p1450_p4 = scmp.lt.s32.totalorder %s1444_s13, %s1444_s13 }
  0x2e   :  { %vm290_vm11 = vcmask 1045504   ;;  %vm239_vm12 = vcmask 777216   ;;  %vm295_vm13 = vcmask 1046528   ;;  %vm300_vm14 = vcmask 72704  }
  0x2f   :  { %vm260_vm15 = vcmask 769024   ;;  %p1451_p5 = por %p1450_p4, %p1449_p3 }
  0x31   :  { %105 = vrot.lane.b32.xlu0 %v88_v5, %s1475_s5  ;;  %109 = vrot.lane.b32.xlu1 %v96_v8, %s1475_s5  ;;  %p1452_p6 = pnand %p1451_p5, %p1445_p2 }
  0x35   :  { %101 = vrot.lane.b32.xlu0 %v80_v10, %s1475_s5  ;;  %111 = vrot.lane.b32.xlu1 %v100_v11, %s1475_s5 }
  0x39   :  { %124 = vrot.lane.b32.xlu0 %v84_v6, %s1474_s4  ;;  %107 = vrot.lane.b32.xlu1 %v92_v12, %s1475_s5 }
  0x3d   :  { %130 = vrot.lane.b32.xlu0 %v96_v8, %s1474_s4  ;;  %132 = vrot.lane.b32.xlu1 %v100_v11, %s1474_s4 }
  0x41   :  { %122 = vrot.lane.b32.xlu0 %v80_v10, %s1474_s4  ;;  %128 = vrot.lane.b32.xlu1 %v92_v12, %s1474_s4 }
  0x45   :  { %145 = vrot.lane.b32.xlu0 %v84_v6, %s1476_s1  ;;  %147 = vrot.lane.b32.xlu1 %v88_v5, %s1476_s1 }
  0x49   :  { %151 = vrot.lane.b32.xlu0 %v96_v8, %s1476_s1  ;;  %153 = vrot.lane.b32.xlu1 %v100_v11, %s1476_s1 }
  0x4d   :  { %143 = vrot.lane.b32.xlu0 %v80_v10, %s1476_s1  ;;  %149 = vrot.lane.b32.xlu1 %v92_v12, %s1476_s1 }
  0x51   :  { %166 = vrot.lane.b32.xlu0 %v84_v6, %s1477_s6  ;;  %168 = vrot.lane.b32.xlu1 %v88_v5, %s1477_s6 }
  0x55   :  { %172 = vrot.lane.b32.xlu0 %v96_v8, %s1477_s6  ;;  %174 = vrot.lane.b32.xlu1 %v100_v11, %s1477_s6 }
  0x59   :  { %164 = vrot.lane.b32.xlu0 %v80_v10, %s1477_s6  ;;  %170 = vrot.lane.b32.xlu1 %v92_v12, %s1477_s6 }
  0x5d   :  { %187 = vrot.lane.b32.xlu0 %v84_v6, %s1478_s7  ;;  %189 = vrot.lane.b32.xlu1 %v88_v5, %s1478_s7 }
  0x61   :  { %193 = vrot.lane.b32.xlu0 %v96_v8, %s1478_s7  ;;  %195 = vrot.lane.b32.xlu1 %v100_v11, %s1478_s7 }
  0x65   :  { %185 = vrot.lane.b32.xlu0 %v80_v10, %s1478_s7  ;;  %191 = vrot.lane.b32.xlu1 %v92_v12, %s1478_s7 }
  0x69   :  { %208 = vrot.lane.b32.xlu0 %v84_v6, %s1479_s8  ;;  %210 = vrot.lane.b32.xlu1 %v88_v5, %s1479_s8 }
  0x6d   :  { %214 = vrot.lane.b32.xlu0 %v96_v8, %s1479_s8  ;;  %216 = vrot.lane.b32.xlu1 %v100_v11, %s1479_s8 }
  0x71   :  { %206 = vrot.lane.b32.xlu0 %v80_v10, %s1479_s8  ;;  %212 = vrot.lane.b32.xlu1 %v92_v12, %s1479_s8 }
  0x75   :  { %229 = vrot.lane.b32.xlu0 %v84_v6, %s1480_s9  ;;  %231 = vrot.lane.b32.xlu1 %v88_v5, %s1480_s9 }
  0x79   :  { %235 = vrot.lane.b32.xlu0 %v96_v8, %s1480_s9  ;;  %237 = vrot.lane.b32.xlu1 %v100_v11, %s1480_s9 }
  0x7d   :  { %250 = vrot.lane.b32.xlu0 %v84_v6, %s1481_s10  ;;  %252 = vrot.lane.b32.xlu1 %v88_v5, %s1481_s10 }
  0x81   :  { %256 = vrot.lane.b32.xlu0 %v96_v8, %s1481_s10  ;;  %258 = vrot.lane.b32.xlu1 %v100_v11, %s1481_s10 }
  0x85   :  { %227 = vrot.lane.b32.xlu0 %v80_v10, %s1480_s9  ;;  %233 = vrot.lane.b32.xlu1 %v92_v12, %s1480_s9 }
  0x89   :  { %248 = vrot.lane.b32.xlu0 %v80_v10, %s1481_s10  ;;  %254 = vrot.lane.b32.xlu1 %v92_v12, %s1481_s10 }
  0x9f   :  { %v127_v15 = vpop.permute.xlu1 %126  ;;  %v104_v16 = vpop.permute.xlu0 %103 }
  0xa3   :  { %v106_v19 = vpop.permute.xlu0 %105  ;;  %v110_v20 = vpop.permute.xlu1 %109 }
  0xa4   :  { %v115_v21 = vsel %vm113_vm0, %v104_v16, %v106_v19 }
  0xa5   :  { %v267_v22 = vsel %vm265_vm1, %v64_v17, %v115_v21  ;;  %v36_v17 = vld [vmem:[#allocation2] sm:$0xff] }
  0xa7   :  { %v102_v25 = vpop.permute.xlu0 %101  ;;  %v112_v26 = vpop.permute.xlu1 %111 }
  0xa8   :  { %v114_v27 = vsel %vm113_vm0, %v102_v25, %v104_v16  ;;  %v117_v28 = vsel %vm113_vm0, %v110_v20, %v112_v26 }
  0xa9   :  { %v266_v29 = vsel %vm265_vm1, %v60_v23, %v114_v27  ;;  %v1544_v30 = vsel %vm265_vm1, %v72_v24, %v117_v28  ;;  %v302_v28 = vsel %vm300_vm14, %v36_v17, 0 }
  0xab   :  { %v125_v32 = vpop.permute.xlu0 %124  ;;  %v108_v33 = vpop.permute.xlu1 %107 }
  0xac   :  { %v136_v34 = vsel %vm134_vm2, %v125_v32, %v127_v15  ;;  %v116_v35 = vsel %vm113_vm0, %v108_v33, %v110_v20 }
  0xad   :  { %v272_v36 = vsel %vm270_vm3, %v267_v22, %v136_v34  ;;  %v268_v37 = vsel %vm265_vm1, %v68_v31, %v116_v35 }
  0xaf   :  { %v131_v38 = vpop.permute.xlu0 %130  ;;  %v133_v39 = vpop.permute.xlu1 %132 }
  0xb0   :  { %v138_v8 = vsel %vm134_vm2, %v131_v38, %v133_v39 }
  0xb1   :  { %v274_v18 = vsel %vm270_vm3, %v1544_v30, %v138_v8 }
  0xb3   :  { %v123_v40 = vpop.permute.xlu0 %122  ;;  %v129_v41 = vpop.permute.xlu1 %128 }
  0xb4   :  { %v135_v42 = vsel %vm134_vm2, %v123_v40, %v125_v32  ;;  %v137_v43 = vsel %vm134_vm2, %v129_v41, %v131_v38 }
  0xb5   :  { %v271_v44 = vsel %vm270_vm3, %v266_v29, %v135_v42  ;;  %v1555_v45 = vsel %vm270_vm3, %v268_v37, %v137_v43  ;;  %v1609_v37 = vand.u32 4294901760, %v302_v28 }
  0xb7   :  { %v146_v46 = vpop.permute.xlu0 %145  ;;  %v148_v47 = vpop.permute.xlu1 %147 }
  0xb8   :  { %v157_v9 = vsel %vm155_vm4, %v146_v46, %v148_v47  ;;  %v1618_v47 = vsub.f32 %v302_v28, %v1609_v37 }
  0xb9   :  { %v277_v19 = vsel %vm275_vm5, %v272_v36, %v157_v9 }
  0xbb   :  { %v1557_v48 = vpop.permute.xlu0 %151  ;;  %v154_v49 = vpop.permute.xlu1 %153 }
  0xbc   :  { %v159_v10 = vsel %vm155_vm4, %v1557_v48, %v154_v49 }
  0xbd   :  { %v279_v22 = vsel %vm275_vm5, %v274_v18, %v159_v10 }
  0xbf   :  { %v144_v50 = vpop.permute.xlu0 %143  ;;  %v150_v51 = vpop.permute.xlu1 %149 }
  0xc0   :  { %v156_v52 = vsel %vm155_vm4, %v144_v50, %v146_v46  ;;  %v158_v38 = vsel %vm155_vm4, %v150_v51, %v1557_v48 }
  0xc1   :  { %v1561_v53 = vsel %vm275_vm5, %v271_v44, %v156_v52  ;;  %v278_v44 = vsel %vm275_vm5, %v1555_v45, %v158_v38 }
  0xc3   :  { %v1563_v54 = vpop.permute.xlu0 %166  ;;  %v169_v55 = vpop.permute.xlu1 %168 }
  0xc4   :  { %v178_v11 = vsel %vm176_vm6, %v1563_v54, %v169_v55 }
  0xc5   :  { %v282_v23 = vsel %vm280_vm7, %v277_v19, %v178_v11 }
  0xc7   :  { %v1565_v56 = vpop.permute.xlu0 %172  ;;  %v175_v57 = vpop.permute.xlu1 %174 }
  0xc8   :  { %v180_v12 = vsel %vm176_vm6, %v1565_v56, %v175_v57 }
  0xc9   :  { %v284_v26 = vsel %vm280_vm7, %v279_v22, %v180_v12 }
  0xcb   :  { %v1567_v58 = vpop.permute.xlu0 %164  ;;  %v1569_v59 = vpop.permute.xlu1 %170 }
  0xcc   :  { %v177_v49 = vsel %vm176_vm6, %v1567_v58, %v1563_v54  ;;  %v179_v48 = vsel %vm176_vm6, %v1569_v59, %v1565_v56 }
  0xcf   :  { %v1571_v60 = vpop.permute.xlu0 %187  ;;  %v190_v61 = vpop.permute.xlu1 %189 }
  0xd0   :  { %v199_v14 = vsel %vm197_vm8, %v1571_v60, %v190_v61 }
  0xd1   :  { %v287_v27 = vsel %vm285_vm9, %v282_v23, %v199_v14 }
  0xd3   :  { %v1573_v62 = vpop.permute.xlu0 %193  ;;  %v196_v63 = vpop.permute.xlu1 %195 }
  0xd4   :  { %v201_v20 = vsel %vm197_vm8, %v1573_v62, %v196_v63 }
  0xd5   :  { %v289_v29 = vsel %vm285_vm9, %v284_v26, %v201_v20 }
  0xd7   :  { %v186_v0 = vpop.permute.xlu0 %185  ;;  %v192_v1 = vpop.permute.xlu1 %191 }
  0xd8   :  { %v198_v50 = vsel %vm197_vm8, %v186_v0, %v1571_v60  ;;  %v200_v45 = vsel %vm197_vm8, %v192_v1, %v1573_v62  ;;  %v281_v60 = vsel %vm280_vm7, %v1561_v53, %v177_v49  ;;  %v283_v62 = vsel %vm280_vm7, %v278_v44, %v179_v48 }
  0xd9   :  { %v1647_v1 = vand.u32 4294901760, %v1618_v47 }
  0xdb   :  { %v209_v2 = vpop.permute.xlu0 %208  ;;  %v211_v3 = vpop.permute.xlu1 %210  ;;  %v380_v26 = vsub.f32 %v1618_v47, %v1647_v1 }
  0xdc   :  { %v220_v21 = vsel %vm218_vm10, %v209_v2, %v211_v3  ;;  %v288_v3 = vsel %vm285_vm9, %v283_v62, %v200_v45 }
  0xdd   :  { %v292_v30 = vsel %vm290_vm11, %v287_v27, %v220_v21 }
  0xdf   :  { %v1575_v4 = vpop.permute.xlu0 %214  ;;  %v217_v5 = vpop.permute.xlu1 %216 }
  0xe0   :  { %v222_v24 = vsel %vm218_vm10, %v1575_v4, %v217_v5 }
  0xe1   :  { %v294_v33 = vsel %vm290_vm11, %v289_v29, %v222_v24 }
  0xe3   :  { %v207_v6 = vpop.permute.xlu0 %206  ;;  %v213_v7 = vpop.permute.xlu1 %212 }
  0xe4   :  { %v219_v52 = vsel %vm218_vm10, %v207_v6, %v209_v2  ;;  %v221_v54 = vsel %vm218_vm10, %v213_v7, %v1575_v4  ;;  %v286_v2 = vsel %vm285_vm9, %v281_v60, %v198_v50 }
  0xe5   :  { %v291_v6 = vsel %vm290_vm11, %v286_v2, %v219_v52  ;;  %v293_v53 = vsel %vm290_vm11, %v288_v3, %v221_v54 }
  0xe7   :  { %v1587_v15 = vpop.permute.xlu0 %229  ;;  %v232_v16 = vpop.permute.xlu1 %231 }
  0xe8   :  { %v241_v25 = vsel %vm239_vm12, %v1587_v15, %v232_v16 }
  0xe9   :  { %v297_v34 = vsel %vm295_vm13, %v292_v30, %v241_v25 }
  0xea   :  { %v308_v39 = vand.u32 4294901760, %v297_v34 }
  0xeb   :  { %v236_v31 = vpop.permute.xlu0 %235  ;;  %v238_v32 = vpop.permute.xlu1 %237 }
  0xec   :  { %v243_v35 = vsel %vm239_vm12, %v236_v31, %v238_v32  ;;  %v1631_v55 = vsub.f32 %v297_v34, %v308_v39 }
  0xed   :  { %v299_v36 = vsel %vm295_vm13, %v294_v33, %v243_v35 }
  0xee   :  { %v803_v40 = vand.u32 4294901760, %v299_v36  ;;  %v390_v9 = vand.u32 4294901760, %v1631_v55 }
  0xef   :  { %v251_v41 = vpop.permute.xlu0 %250  ;;  %v253_v42 = vpop.permute.xlu1 %252 }
  0xf0   :  { %v262_v43 = vsel %vm260_vm15, %v251_v41, %v253_v42  ;;  %v1633_v57 = vsub.f32 %v299_v36, %v803_v40  ;;  %v391_v24 = vsub.f32 %v1631_v55, %v390_v9 }
  0xf1   :  { %v306_v46 = vsel %vm265_vm1, %v262_v43, 0 }
  0xf2   :  { %v312_v51 = vand.u32 4294901760, %v306_v46  ;;  %v885_v10 = vand.u32 4294901760, %v1633_v57 }
  0xf3   :  { %v257_v61 = vpop.permute.xlu0 %256  ;;  %v259_v63 = vpop.permute.xlu1 %258 }
  0xf4   :  { %v1637_v58 = vsub.f32 %v306_v46, %v312_v51  ;;  %v264_v56 = vsel %vm260_vm15, %v257_v61, %v259_v63  ;;  %v1640_v59 = vpack.c.bf16 %v312_v51, %v308_v39  ;;  %v886_v25 = vsub.f32 %v1633_v57, %v885_v10 }
  0xf5   :  { %v801_v0 = vsel %vm265_vm1, %v264_v56, 0  ;;  %v381_v46 = vand.u32 4294901760, %v380_v26 }
  0xf6   :  { %v402_v4 = vand.u32 4294901760, %v1637_v58  ;;  %v807_v5 = vand.u32 4294901760, %v801_v0  ;;  %1319 = vmatprep.subr.bf16.mxu0 %v1640_v59  ;;  %v887_v42 = vand.u32 4294901760, %v886_v25 }
  0xf7   :  { %v228_v7 = vpop.permute.xlu0 %227  ;;  %v234_v8 = vpop.permute.xlu1 %233 }
  0xf8   :  { %v1657_v11 = vsub.f32 %v801_v0, %v807_v5  ;;  %v240_v12 = vsel %vm239_vm12, %v228_v7, %v1587_v15  ;;  %v242_v14 = vsel %vm239_vm12, %v234_v8, %v236_v31  ;;  %v1662_v16 = vpack.c.bf16 %v807_v5, %v803_v40 }
  0xf9   :  { %v296_v17 = vsel %vm295_vm13, %v291_v6, %v240_v12  ;;  %v298_v18 = vsel %vm295_vm13, %v293_v53, %v242_v14  ;;  %v403_v19 = vsub.f32 %v1637_v58, %v402_v4  ;;  %v392_v40 = vand.u32 4294901760, %v391_v24 }
  0xfa   :  { %v897_v20 = vand.u32 4294901760, %v1657_v11  ;;  %v310_v21 = vand.u32 4294901760, %v296_v17  ;;  %v805_v22 = vand.u32 4294901760, %v298_v18  ;;  %1343 = vmatprep.subr.bf16.mxu1 %v1662_v16  ;;  %v1326_v6 = vpack.c.bf16 %v1637_v58, %v1631_v55 }
  0xfb   :  { %v249_v23 = vpop.permute.xlu0 %248  ;;  %v255_v15 = vpop.permute.xlu1 %254  ;;  %v404_v33 = vand.u32 4294901760, %v403_v19  ;;  %v1350_v53 = vpack.c.bf16 %v1657_v11, %v1633_v57  ;;  %v1334_v12 = vpack.c.bf16 %v402_v4, %v390_v9 }
  0xfc   :  { %v1679_v27 = vsub.f32 %v296_v17, %v310_v21  ;;  %v1681_v28 = vsub.f32 %v298_v18, %v805_v22  ;;  %v261_v29 = vsel %vm260_vm15, %v249_v23, %v251_v41  ;;  %v263_v30 = vsel %vm260_vm15, %v255_v15, %v257_v61 }
  0xfd   :  { %v304_v31 = vsel %vm265_vm1, %v261_v29, 0  ;;  %v799_v32 = vsel %vm265_vm1, %v263_v30, 0  ;;  %v898_v34 = vsub.f32 %v1657_v11, %v897_v20  ;;  %v1322_v50 = vpack.c.bf16 %v404_v33, %v392_v40 }
  0xfe   :  { %v396_v35 = vand.u32 4294901760, %v1679_v27  ;;  %v891_v36 = vand.u32 4294901760, %v1681_v28  ;;  %v314_v38 = vand.u32 4294901760, %v304_v31  ;;  %v809_v39 = vand.u32 4294901760, %v799_v32 }
  0xff   :  { %v899_v41 = vand.u32 4294901760, %v898_v34  ;;  %v1358_v14 = vpack.c.bf16 %v897_v20, %v885_v10 }
 0x100   :  { %v407_v43 = vsub.f32 %v304_v31, %v314_v38  ;;  %v902_v44 = vsub.f32 %v799_v32, %v809_v39  ;;  %v1320_v49 = vpack.c.bf16 %v314_v38, %v310_v21  ;;  %v1344_v48 = vpack.c.bf16 %v809_v39, %v805_v22 }
 0x101   :  { %v1346_v51 = vpack.c.bf16 %v899_v41, %v887_v42  ;;  %v397_v45 = vsub.f32 %v1679_v27, %v396_v35  ;;  %v892_v52 = vsub.f32 %v1681_v28, %v891_v36 }
 0x102   :  { %v408_v61 = vand.u32 4294901760, %v407_v43  ;;  %v903_v63 = vand.u32 4294901760, %v902_v44  ;;  %1321 = vmatpush1.bf16.msra.mxu0 %v1320_v49  ;;  %1345 = vmatpush1.bf16.msra.mxu1 %v1344_v48  ;;  %v1328_v7 = vpack.c.bf16 %v407_v43, %v1679_v27  ;;  %v1352_v8 = vpack.c.bf16 %v902_v44, %v1681_v28 }
 0x103   :  { %1323 = vmatprep.subr.bf16.mxu0 %v1322_v50  ;;  %1347 = vmatprep.subr.bf16.mxu1 %v1346_v51  ;;  %v398_v0 = vand.u32 4294901760, %v397_v45  ;;  %v893_v2 = vand.u32 4294901760, %v892_v52 }
 0x104   :  { %v409_v54 = vsub.f32 %v407_v43, %v408_v61  ;;  %v904_v56 = vsub.f32 %v902_v44, %v903_v63  ;;  %v1336_v17 = vpack.c.bf16 %v408_v61, %v396_v35 }
 0x105   :  { %382 = vmatmul.mubr.f32.vlgmr.msra.gmra.mrb[0].mxu0 %v381_v46  ;;  %877 = vmatmul.mubr.f32.vlgmr.msra.gmra.mrb[0].mxu1 %v381_v46 }
 0x106   :  { %v410_v60 = vand.u32 4294901760, %v409_v54  ;;  %v905_v62 = vand.u32 4294901760, %v904_v56  ;;  %472 = vmatprep.mubr.f32.mxu0 %v1482_v13  ;;  %967 = vmatprep.mubr.f32.mxu1 %v1482_v13 }
 0x108   :  { %v1324_v3 = vpack.c.bf16 %v410_v60, %v398_v0  ;;  %v1348_v5 = vpack.c.bf16 %v905_v62, %v893_v2 }
 0x10a   :  { %1325 = vmatpush1.bf16.msra.mxu0 %v1324_v3  ;;  %1349 = vmatpush1.bf16.msra.mxu1 %v1348_v5 }
 0x10b   :  { %1327 = vmatprep.subr.bf16.mxu0 %v1326_v6  ;;  %1351 = vmatprep.subr.bf16.mxu1 %v1350_v53 }
 0x10d   :  { %474 = vmatmul.mubr.f32.vlgmr.msra.gmra.mrb[0].mxu0 %v1609_v37  ;;  %969 = vmatmul.mubr.f32.vlgmr.msra.gmra.mrb[0].mxu1 %v1609_v37 }
 0x10e   :  { %1329 = vmatpush1.bf16.msra.mxu0 %v1328_v7  ;;  %1353 = vmatpush1.bf16.msra.mxu1 %v1352_v8 }
 0x10f   :  { %1331 = vmatprep.subr.bf16.mxu0 %v1640_v59  ;;  %1355 = vmatprep.subr.bf16.mxu1 %v1662_v16 }
 0x110   :  { %552 = vmatprep.mubr.f32.mxu0 %v1482_v13  ;;  %1047 = vmatprep.mubr.f32.mxu1 %v1482_v13 }
 0x115   :  { %555 = vmatmul.mubr.f32.vlgmr.msra.gmra.mrb[0].mxu0 %v1618_v47  ;;  %1050 = vmatmul.mubr.f32.vlgmr.msra.gmra.mrb[0].mxu1 %v1618_v47  ;;  %v1360_v47 = vpack.c.bf16 %v903_v63, %v891_v36 }
 0x116   :  { %1333 = vmatpush1.bf16.msra.mxu0 %v1320_v49  ;;  %1357 = vmatpush1.bf16.msra.mxu1 %v1344_v48 }
 0x117   :  { %1335 = vmatprep.subr.bf16.mxu0 %v1334_v12  ;;  %1359 = vmatprep.subr.bf16.mxu1 %v1358_v14 }
 0x118   :  { %629 = vmatprep.mubr.f32.mxu0 %v1482_v13  ;;  %1124 = vmatprep.mubr.f32.mxu1 %v1482_v13 }
 0x11d   :  { %633 = vmatmul.mubr.f32.vlgmr.msra.gmra.mrb[0].mxu0 %v1647_v1  ;;  %1128 = vmatmul.mubr.f32.vlgmr.msra.gmra.mrb[0].mxu1 %v1647_v1 }
 0x11e   :  { %1337 = vmatpush1.bf16.msra.mxu0 %v1336_v17  ;;  %1361 = vmatpush1.bf16.msra.mxu1 %v1360_v47 }
 0x11f   :  { %1339 = vmatprep.subr.bf16.mxu0 %v1640_v59  ;;  %1363 = vmatprep.subr.bf16.mxu1 %v1662_v16 }
 0x120   :  { %715 = vmatprep.mubr.f32.mxu0 %v1482_v13  ;;  %1210 = vmatprep.mubr.f32.mxu1 %v1482_v13 }
 0x125   :  { %717 = vmatmul.mubr.f32.vlgmr.msra.gmra.mrb[0].mxu0 %v1609_v37  ;;  %1212 = vmatmul.mubr.f32.vlgmr.msra.gmra.mrb[0].mxu1 %v1609_v37 }
 0x126   :  { %1341 = vmatpush1.bf16.msra.mxu0 %v1320_v49  ;;  %1365 = vmatpush1.bf16.msra.mxu1 %v1344_v48 }
 0x127   :  { %791 = vmatprep.mubr.f32.mxu0 %v1482_v13  ;;  %1286 = vmatprep.mubr.f32.mxu1 %v1482_v13 }
 0x12d   :  { %793 = vmatmul.mubr.f32.vlgmr.msra.gmra.mrb[0].mxu0 %v1609_v37  ;;  %1288 = vmatmul.mubr.f32.vlgmr.msra.gmra.mrb[0].mxu1 %v1609_v37 }
 0x200   :  { %v794_v55 = vpop.f32.mrb[0].mxu0  ;;  %v1289_v57 = vpop.f32.mrb[0].mxu1 }
 0x201   :  { %1294 = vst [vmem:[#allocation7] sm:$0xff] %v794_v55  ;;  %1296 = vst [vmem:[#allocation7 + $0x10] sm:$0xff] %v1289_v57  ;;  %v796_v58 = vpop.f32.mrb[1].mxu0  ;;  %v1291_v59 = vpop.f32.mrb[1].mxu1 }
 0x202   :  { %1295 = vst [vmem:[#allocation7 + $0x8] sm:$0xff] %v796_v58  ;;  %1297 = vst [vmem:[#allocation7 + $0x18] sm:$0xff] %v1291_v59 }
 0x203   :  { %1455 = shalt.err (!%p1452_p6)
}
 0x204   :  { %s1456_s16 = scalar_lea.hbm %s1746_s2, 512 }
 0x205   :  { %p1457_p7 = scmp.ne.s32.totalorder %s1746_s2, %s1456_s16  ;;  %p1460_p8 = scmp.lt.u32.totalorder %s1456_s16, %s1746_s2 }
 0x207   :  { %p1462_p9 = pnand %p1460_p8, %p1457_p7 }
 0x209   :  { %1465 = shalt.err (!%p1462_p9)
}
 0x20a   :  { %s1484_s21 = smov 256   ;;  %s1485_s22 = smov 16  }
 0x20b   :  { %1309 = dma.vmem_to_hbm [thread:$0]  %s1304_s12, 512, %s1746_s2, [#allocation4], %s1484_s21, %s1484_s21, %s1485_s22  }
 0x20c   :  { %1470 = dma.done.wait [#allocation4], 512  }
 0x20d   :  { %1471 = vsyncadd [#allocation4], 4294966784 }
 0x20e   :  { %1313 = vsyncpa [#allocation3], 1 }
 0x20f   :  { %1314 = vsyncpa [#allocation6], 1 }
 0x210   :  { %1315 = vsyncpa [#allocation4], 1 }

</bundles_post_ra>
